<compile_context>
chip_gen: v5e
topology: v5e:2x2
jax: 0.10.0
libtpu: 0.0.40
codegen_flags: <defaults>
</compile_context>

<pallas_src>
import jax
import jax.numpy as jnp
from jax.experimental import pallas as pl
from jax.experimental.pallas import tpu as pltpu


def interpolator_kernel(x_ref, wseq_ref, bseq_ref, wfeat_t_ref, bfeat_ref, o_ref):
    bb, l_in, f = x_ref.shape
    ts = wseq_ref.shape[1]

    # sequence_inter (transposes eliminated algebraically):
    #   y[b] = W_seq @ x[b] + b_seq[:, None]              -> (bb, ts, f)
    y = jnp.einsum("btl,blf->btf", wseq_ref[...], x_ref[...],
                   preferred_element_type=jnp.float32)
    y = y + bseq_ref[...][None, :, :]

    # feature_inter, flattened across the whole batch block:
    #   (bb*ts, f) @ (f, f)  -- one big-M matmul instead of bb tiny ones
    out = jnp.dot(y.reshape(bb * ts, f), wfeat_t_ref[...],
                  preferred_element_type=jnp.float32)
    out = out + bfeat_ref[...]
    o_ref[...] = out.reshape(bb, ts, f).astype(o_ref.dtype)


def interpolator(x, w_seq, b_seq, w_feat, b_feat, *, block_b=None):
    """x: (b, l_in, f); w_seq: (ts, l_in); b_seq: (ts,);
       w_feat: (f, f); b_feat: (f,). Returns (b, ts, f)."""
    b, l_in, f = x.shape
    ts = w_seq.shape[0]

    if block_b is None:
        block_b = max(1, min(b, 128))   # sweepable: big blocks amortize per-step overhead
    nblk = pl.cdiv(b, block_b)
    b_pad = nblk * block_b
    if b_pad != b:                      # pad batch so every block is full
        x = jnp.pad(x, ((0, b_pad - b), (0, 0), (0, 0)))

    # Parameters pre-arranged once at trace time (no in-kernel .T / broadcasts):
    w_seq_b = jnp.broadcast_to(w_seq[None, :, :], (block_b, ts, l_in))
    w_feat_t = w_feat.T                                 # y @ W_feat^T == y @ w_feat_t
    b_seq_2d = jnp.broadcast_to(b_seq.reshape(ts, 1), (ts, f))
    b_feat_2d = b_feat.reshape(1, f)

    flops = 2 * b_pad * ts * f * (l_in + f)
    bytes_accessed = 4 * (b_pad * l_in * f + b_pad * ts * f
                          + block_b * ts * l_in + ts * f + f * f + f)

    out = pl.pallas_call(
        interpolator_kernel,
        out_shape=jax.ShapeDtypeStruct((b_pad, ts, f), x.dtype),
        grid=(nblk,),
        in_specs=[
            pl.BlockSpec((block_b, l_in, f), lambda i: (i, 0, 0)),    # x (batch tile)
            pl.BlockSpec((block_b, ts, l_in), lambda i: (0, 0, 0)),   # W_seq (broadcast, resident)
            pl.BlockSpec((ts, f), lambda i: (0, 0)),                  # b_seq (pre-broadcast)
            pl.BlockSpec((f, f), lambda i: (0, 0)),                   # W_feat^T
            pl.BlockSpec((1, f), lambda i: (0, 0)),                   # b_feat
        ],
        out_specs=pl.BlockSpec((block_b, ts, f), lambda i: (i, 0, 0)),
        compiler_params=pltpu.CompilerParams(
            dimension_semantics=("parallel",)),
        cost_estimate=pl.CostEstimate(
            flops=int(flops), transcendentals=0,
            bytes_accessed=int(bytes_accessed)),
    )(x, w_seq_b, b_seq_2d, w_feat_t, b_feat_2d)
    return out[:b]


def reference(x, w_seq, b_seq, w_feat, b_feat):
    xt = jnp.transpose(x, (0, 2, 1))                    # (b, f, l_in)
    seq = jnp.einsum("bfl,tl->bft", xt, w_seq) + b_seq  # (b, f, ts)
    y = jnp.transpose(seq, (0, 2, 1))                   # (b, ts, f)
    return jnp.einsum("btf,gf->btg", y, w_feat) + b_feat


if __name__ == "__main__":
    # Small shapes consistent with the module:
    # ts_size=16, total_mask_size=8 -> l_in=8 ; hidden_dim=32 ; batch=6
    batch, ts_size, total_mask_size, hidden_dim = 6, 16, 8, 32
    l_in = ts_size - total_mask_size

    key = jax.random.PRNGKey(0)
    kx, kws, kbs, kwf, kbf = jax.random.split(key, 5)

    x = jax.random.normal(kx, (batch, l_in, hidden_dim), dtype=jnp.float32)
    # deterministic parameter init (synthetic; shapes follow nn.Linear(out, in))
    w_seq = jax.random.normal(kws, (ts_size, l_in), dtype=jnp.float32) * 0.1
    b_seq = jax.random.normal(kbs, (ts_size,), dtype=jnp.float32) * 0.1
    w_feat = jax.random.normal(kwf, (hidden_dim, hidden_dim), dtype=jnp.float32) * 0.1
    b_feat = jax.random.normal(kbf, (hidden_dim,), dtype=jnp.float32) * 0.1

    # block_b=4 exercises the multi-block grid (megacore-parallel axis) and the
    # padded-last-block path (6 -> 8 rows); larger batches just use bigger blocks.
    out = interpolator(x, w_seq, b_seq, w_feat, b_feat, block_b=4)
    out = jax.block_until_ready(out)

    ref = reference(x, w_seq, b_seq, w_feat, b_feat)
    assert out.shape == (batch, ts_size, hidden_dim)
    assert jnp.allclose(out, ref, atol=1e-4, rtol=1e-4)

    print("KERNEL_OK")
</pallas_src>

<mosaic_0001>
module attributes {stable_mosaic.version = 11 : i64} {
  func.func @interpolator_kernel(%arg0: i32, %arg1: memref<4x8x32xf32, #tpu.memory_space<vmem>>, %arg2: memref<4x16x8xf32, #tpu.memory_space<vmem>>, %arg3: memref<16x32xf32, #tpu.memory_space<vmem>>, %arg4: memref<32x32xf32, #tpu.memory_space<vmem>>, %arg5: memref<1x32xf32, #tpu.memory_space<vmem>>, %arg6: memref<4x16x32xf32, #tpu.memory_space<vmem>>) attributes {dimension_semantics = [#tpu.dimension_semantics<parallel>], iteration_bounds = array<i64: 2>, scalar_prefetch = 0 : i64, scratch_operands = 0 : i64, tpu.core_type = #tpu.core_type<tc>, window_params = [{transform_indices = @transform_0, window_bounds = array<i64: 4, 8, 32>}, {pipeline_mode = #tpu.pipeline_mode<synchronous>, transform_indices = @transform_1, window_bounds = array<i64: 4, 16, 8>}, {pipeline_mode = #tpu.pipeline_mode<synchronous>, transform_indices = @transform_2, window_bounds = array<i64: 16, 32>}, {pipeline_mode = #tpu.pipeline_mode<synchronous>, transform_indices = @transform_3, window_bounds = array<i64: 32, 32>}, {pipeline_mode = #tpu.pipeline_mode<synchronous>, transform_indices = @transform_4, window_bounds = array<i64: 1, 32>}, {transform_indices = @transform_5, window_bounds = array<i64: 4, 16, 32>}]} {
    %c0 = arith.constant 0 : index
    %c0_0 = arith.constant 0 : index
    %c0_1 = arith.constant 0 : index
    %0 = vector.load %arg2[%c0, %c0_0, %c0_1] : memref<4x16x8xf32, #tpu.memory_space<vmem>>, vector<4x16x8xf32>
    %c0_2 = arith.constant 0 : index
    %c0_3 = arith.constant 0 : index
    %c0_4 = arith.constant 0 : index
    %1 = vector.load %arg1[%c0_2, %c0_3, %c0_4] : memref<4x8x32xf32, #tpu.memory_space<vmem>>, vector<4x8x32xf32>
    "tpu.trace_start"() <{level = 10 : i32, message = "btl,blf->btf"}> : () -> ()
    %cst = arith.constant dense<0.000000e+00> : vector<4x16x32xf32>
    %2 = tpu.matmul %0, %1, %cst {dimension_numbers = #tpu.dot_dimension_numbers<[2], [1], [1], [2], [0, 0, 0, 1, 1, 2], [0], [0]>} : vector<4x16x8xf32>, vector<4x8x32xf32>, vector<4x16x32xf32> -> vector<4x16x32xf32>
    "tpu.trace_stop"() : () -> ()
    %c0_5 = arith.constant 0 : index
    %c0_6 = arith.constant 0 : index
    %3 = vector.load %arg3[%c0_5, %c0_6] : memref<16x32xf32, #tpu.memory_space<vmem>>, vector<16x32xf32>
    %4 = vector.shape_cast %3 : vector<16x32xf32> to vector<1x16x32xf32>
    %5 = vector.broadcast %4 : vector<1x16x32xf32> to vector<4x16x32xf32>
    %6 = arith.addf %2, %5 : vector<4x16x32xf32>
    %7 = vector.shape_cast %6 : vector<4x16x32xf32> to vector<64x32xf32>
    %c0_7 = arith.constant 0 : index
    %c0_8 = arith.constant 0 : index
    %8 = vector.load %arg4[%c0_7, %c0_8] : memref<32x32xf32, #tpu.memory_space<vmem>>, vector<32x32xf32>
    %cst_9 = arith.constant dense<0.000000e+00> : vector<64x32xf32>
    %9 = tpu.matmul %7, %8, %cst_9 {dimension_numbers = #tpu.dot_dimension_numbers<[1], [0], [0], [1], [0, 0, 1, 1], [], []>} : vector<64x32xf32>, vector<32x32xf32>, vector<64x32xf32> -> vector<64x32xf32>
    %c0_10 = arith.constant 0 : index
    %c0_11 = arith.constant 0 : index
    %10 = vector.load %arg5[%c0_10, %c0_11] : memref<1x32xf32, #tpu.memory_space<vmem>>, vector<1x32xf32>
    %11 = vector.broadcast %10 : vector<1x32xf32> to vector<64x32xf32>
    %12 = arith.addf %9, %11 : vector<64x32xf32>
    %13 = vector.shape_cast %12 : vector<64x32xf32> to vector<4x16x32xf32>
    %c0_12 = arith.constant 0 : index
    %c0_13 = arith.constant 0 : index
    %c0_14 = arith.constant 0 : index
    %14 = vector.load %arg6[%c0_12, %c0_13, %c0_14] : memref<4x16x32xf32, #tpu.memory_space<vmem>>, vector<4x16x32xf32>
    tpu.vector_store %arg6[%c0_12, %c0_13, %c0_14], %13 {strides = array<i32>} : memref<4x16x32xf32, #tpu.memory_space<vmem>>, vector<4x16x32xf32>,
    return
  }
  func.func @transform_0(%arg0: i32) -> (i32, i32, i32) {
    %c0_i32 = arith.constant 0 : i32
    %c0_i32_0 = arith.constant 0 : i32
    %c0_i32_1 = arith.constant 0 : i32
    return %arg0, %c0_i32, %c0_i32_0 : i32, i32, i32
  }
  func.func @transform_1(%arg0: i32) -> (i32, i32, i32) {
    %c0_i32 = arith.constant 0 : i32
    %c0_i32_0 = arith.constant 0 : i32
    %c0_i32_1 = arith.constant 0 : i32
    %c0_i32_2 = arith.constant 0 : i32
    return %c0_i32, %c0_i32_0, %c0_i32_1 : i32, i32, i32
  }
  func.func @transform_2(%arg0: i32) -> (i32, i32) {
    %c0_i32 = arith.constant 0 : i32
    %c0_i32_0 = arith.constant 0 : i32
    %c0_i32_1 = arith.constant 0 : i32
    return %c0_i32, %c0_i32_0 : i32, i32
  }
  func.func @transform_3(%arg0: i32) -> (i32, i32) {
    %c0_i32 = arith.constant 0 : i32
    %c0_i32_0 = arith.constant 0 : i32
    %c0_i32_1 = arith.constant 0 : i32
    return %c0_i32, %c0_i32_0 : i32, i32
  }
  func.func @transform_4(%arg0: i32) -> (i32, i32) {
    %c0_i32 = arith.constant 0 : i32
    %c0_i32_0 = arith.constant 0 : i32
    %c0_i32_1 = arith.constant 0 : i32
    return %c0_i32, %c0_i32_0 : i32, i32
  }
  func.func @transform_5(%arg0: i32) -> (i32, i32, i32) {
    %c0_i32 = arith.constant 0 : i32
    %c0_i32_0 = arith.constant 0 : i32
    %c0_i32_1 = arith.constant 0 : i32
    return %arg0, %c0_i32, %c0_i32_0 : i32, i32, i32
  }
}

</mosaic_0001>

<bundles_post_ra>
// kernel: tpu_custom_call.1
= control target key start
LH: loop header
LB: loop body
LE: loop exit
PB: predicated region body
PF: predicated region fallthrough
CT: control target
= control target key end

     0   :  { %10 = vsyncpa [#allocation3], 0  ;;  %s941_s0 = inlined_call_operand.vmem [shape: f32[8,8,32], index: 0, kind: input, shape index: {}]   ;;  %s942_s1 = inlined_call_operand.vmem [shape: f32[4,16,8], index: 1, kind: input, shape index: {}]   ;;  %s943_s2 = inlined_call_operand.hbm [shape: f32[16,32], index: 2, kind: input, shape index: {}]   ;;  %s944_s3 = inlined_call_operand.vmem [shape: f32[32,32], index: 3, kind: input, shape index: {}]   ;;  %s945_s4 = inlined_call_operand.vmem [shape: f32[1,32], index: 4, kind: input, shape index: {}]   ;;  %s946_s5 = inlined_call_operand.hbm [shape: f32[8,16,32], index: 5, kind: output, shape index: {}]  }
   0x1   :  { %11 = vsyncpa [#allocation4], 0 }
   0x2   :  { %13 = vsyncpa [#allocation4 + $0x1], 0  ;;  %s780_s18 = smov 0   ;;  %s782_s19 = smov 0  }
   0x3   :  { %s784_s20 = smov 0   ;;  %s786_s21 = smov 0  }
   0x4 LB: > { %s801_s22 = sadd.s32 4294967295, %s743_s21   ;;  %s547_s23 = sadd.s32 4294967294, %s743_s21   ;;  %s743_s21 = sphi %s786_s21, %s952_s21   ;;  %s739_s20 = sphi %s784_s20, %s951_s20   ;;  %s735_s19 = sphi %s782_s19, %s950_s19   ;;  %s731_s18 = sphi %s780_s18, %s949_s18  }
   0x5   : > { %s805_s24 = sadd.s32 1, %s743_s21   ;;  %s136_s25 = sadd.s32 1, %s739_s20 }
   0x6   : > { %s133_s26 = ssub.s32 %s743_s21, %s805_s24  ;;  %p146_p0 = scmp.ne.s32.totalorder %s739_s20, %s735_s19 }
   0x7   : > { %p134_p1 = scmp.eq.s32.totalorder %s133_s26, 0  ;;  %p147_p2 = scmp.eq.s32.totalorder %s801_s22, 1 }
   0x8   : > { %p152_p3 = scmp.ne.s32.totalorder %s735_s19, %s731_s18  ;;  %p153_p4 = scmp.eq.s32.totalorder %s547_s23, 1 }
   0x9   : > { %s816_s27 = scalar_select %p134_p1, %s739_s20, %s136_s25  }
   0xa   : > { %p818_p5 = por %p147_p2, %p146_p0  ;;  %p822_p6 = por %p153_p4, %p152_p3 }
   0xb   : > { %p548_p7 = scmp.ge.s32.totalorder %s743_s21, 1  ;;  %p160_p8 = scmp.lt.s32.totalorder %s743_s21, 3 }
   0xc   : > { %p606_p9 = scmp.eq.s32.totalorder %s801_s22, 0  ;;  %s174_s7 = sshll.u32 %s943_s2, 4  ;;  %s175_s7 = int_to_ptr.hbm [resolvable:$true] %s174_s7 }
   0xd   : > { %p161_p10 = pnand %p548_p7, %p160_p8  ;;  %s745_s8 = smov [#allocation2]  }
   0xe   : > { %s176_s9 = sshll.u32 %s745_s8, 4  ;;  %s746_s10 = smov 128   ;;  %s177_s9 = int_to_ptr.vmem [resolvable:$true] %s176_s9 }
   0xf   : > { %p598_p11 = pneg %p161_p10  ;;  %s747_s11 = smov 8  }
  0x10   : > { %207 = sbr.rel (%p161_p10) target bundleno = 311 (0x137), region = 40 }
  0x11   : > { %p599_p12 = pnand %p606_p9, %p598_p11 }
  0x13   : > { %601 = dma.hbm_to_vmem [thread:$0]  (!%p599_p12), %s175_s7, 256, %s177_s9, [#allocation3], %s746_s10, %s746_s10, %s747_s11  }
  0x15   : > { %722 = dma.done.wait (%p606_p9), [#allocation3], 256  }
  0x16   : > { %724 = vsyncadd (%p606_p9), [#allocation3], 4294967040  ;;  %s554_s12 = sshll.u32 %s801_s22, 2  ;;  %vm257_vm0 = vcmask 64512   ;;  %v247_v2 = vld [vmem:[%s942_s1 + $0x20] sm:$0xff]  ;;  %v249_v3 = vld [vmem:[%s942_s1 + $0x30] sm:$0xff] }
  0x17   : > { %p237_p13 = scmp.lt.s32.totalorder %s554_s12, 7  ;;  %v243_v6 = vld [vmem:[%s942_s1] sm:$0xff]  ;;  %v245_v7 = vld [vmem:[%s942_s1 + $0x10] sm:$0xff]  ;;  %v377_v8 = vld [vmem:[%s944_s3 + $0x18] sm:$0xff]  ;;  %vm382_vm1 = vcmask 261120   ;;  %s233_s9 = sand.u32 1, %s735_s19  }
  0x18   : > { %v376_v9 = vld [vmem:[%s944_s3 + $0x10] sm:$0xff]  ;;  %v375_v10 = vld [vmem:[%s944_s3 + $0x8] sm:$0xff]  ;;  %v250_v12 = vld [vmem:[%s942_s1 + $0x38] sm:$0xff]  ;;  %s553_s10 = sshll.u32 %s233_s9, 6  ;;  %s579_s14 = sshll.u32 %s801_s22, 6 }
  0x19   : > { %s954_s12 = smov (!%p237_p13, %s554_s12), 7  ;;  %v248_v11 = vld [vmem:[%s942_s1 + $0x28] sm:$0xff]  ;;  %v374_v13 = vld [vmem:[%s944_s3] sm:$0xff]  ;;  %v246_v15 = vld [vmem:[%s942_s1 + $0x18] sm:$0xff]  ;;  %s469_s17 = scalar_lea.hbm %s946_s5, %s579_s14 }
  0x1a   : > { %s555_s13 = sshll.u32 %s954_s12, 3  ;;  %v244_v14 = vld [vmem:[%s942_s1 + $0x8] sm:$0xff]  ;;  %v255_v16 = vld [vmem:[#allocation2] sm:$0xff]  ;;  %s472_s25 = sshll.u32 %s469_s17, 4  ;;  %s473_s25 = int_to_ptr.hbm [resolvable:$true] %s472_s25 }
  0x1b   : > { %s240_s16 = scalar_lea.vmem %s941_s0, %s555_s13  ;;  %v256_v25 = vld [vmem:[#allocation2 + $0x8] sm:$0xff]  ;;  %v646_v34 = vld [vmem:[%s945_s4] ss:$0 sm:$0xff]  ;;  %s235_s13 = scalar_lea.vmem [#allocation5], %s553_s10 }
  0x1c   : > { %v253_v0 = vld [vmem:[%s240_s16 + $0x10] sm:$0xff]  ;;  %v254_v1 = vld [vmem:[%s240_s16 + $0x18] sm:$0xff]  ;;  %v251_v4 = vld [vmem:[%s240_s16] sm:$0xff]  ;;  %s470_s23 = sshll.u32 %s235_s13, 4  ;;  %s457_s22 = scalar_lea.sflag [#allocation4], %s233_s9  ;;  %s471_s23 = int_to_ptr.vmem [resolvable:$true] %s470_s23 }
  0x1d   : > { %337 = vmatpush.msra.mxu2 %v253_v0  ;;  %366 = vmatpush.msra.mxu3 %v254_v1  ;;  %v252_v5 = vld [vmem:[%s240_s16 + $0x8] sm:$0xff]  ;;  %s691_s26 = sshra.s32 %s473_s25, 4  ;;  %s697_s8 = scalar_lea.hbm %s946_s5, 128  ;;  %s692_s26 = int_to_ptr.hbm [resolvable:$true] %s691_s26 }
  0x1e   : > { %560 = vmatmul.msk.f32.vlgmr.msra.gmra.mxu2 %vm257_vm0, %v247_v2  ;;  %562 = vmatmul.msk.f32.vlgmr.msra.gmra.mxu3 %vm257_vm0, %v249_v3  ;;  %s693_s30 = scalar_lea.hbm %s692_s26, 64  ;;  %p698_p3 = scmp.lt.s32.totalorder %s692_s26, %s946_s5 }
  0x1f   : > { %279 = vmatpush.msra.mxu0 %v251_v4  ;;  %308 = vmatpush.msra.mxu1 %v252_v5  ;;  %p694_p0 = scmp.ne.s32.totalorder %s692_s26, %s693_s30  ;;  %p699_p4 = scmp.lt.s32.totalorder %s697_s8, %s693_s30 }
  0x20   : > { %556 = vmatmul.msk.f32.vlgmr.msra.gmra.mxu0 %vm257_vm0, %v243_v6  ;;  %558 = vmatmul.msk.f32.vlgmr.msra.gmra.mxu1 %vm257_vm0, %v245_v7 }
  0x21   : > { %581 = vmatpush.msrb.mxu2 %v377_v8  ;;  %582 = vmatpush.msrb.mxu3 %v377_v8  ;;  %p695_p1 = pnand %p694_p0, %p818_p5  ;;  %p700_p7 = por %p699_p4, %p698_p3 }
  0x22   : > { %419 = vmatpush.msrb.mxu0 %v377_v8  ;;  %580 = vmatpush.msrb.mxu1 %v377_v8 }
  0x23   : > { %584 = vmatpush.msrb.mxu2 %v376_v9  ;;  %585 = vmatpush.msrb.mxu3 %v376_v9  ;;  %p696_p2 = pneg %p695_p1 }
  0x24   : > { %420 = vmatpush.msrb.mxu0 %v376_v9  ;;  %583 = vmatpush.msrb.mxu1 %v376_v9 }
  0x25   : > { %587 = vmatpush.msrb.mxu2 %v375_v10  ;;  %588 = vmatpush.msrb.mxu3 %v375_v10  ;;  %p701_p8 = pnand %p700_p7, %p696_p2 }
  0x26   : > { %561 = vmatmul.msk.f32.gmra.mxu2 %vm257_vm0, %v248_v11  ;;  %563 = vmatmul.msk.f32.gmra.mxu3 %vm257_vm0, %v250_v12 }
  0x27   : > { %590 = vmatpush.msrb.mxu2 %v374_v13  ;;  %591 = vmatpush.msrb.mxu3 %v374_v13 }
  0x28   : > { %557 = vmatmul.msk.f32.gmra.mxu0 %vm257_vm0, %v244_v14  ;;  %559 = vmatmul.msk.f32.gmra.mxu1 %vm257_vm0, %v246_v15 }
  0x29   : > { %421 = vmatpush.msrb.mxu0 %v375_v10  ;;  %586 = vmatpush.msrb.mxu1 %v375_v10 }
  0x2b   : > { %422 = vmatpush.msrb.mxu0 %v374_v13  ;;  %589 = vmatpush.msrb.mxu1 %v374_v13 }
  0x9d   : > { %v281_v17 = vpop.f32.mrf.mxu0  ;;  %v310_v18 = vpop.f32.mrf.mxu1 }
  0x9e   : > { %v282_v19 = vadd.f32 %v281_v17, %v255_v16  ;;  %v311_v20 = vadd.f32 %v310_v18, %v255_v16 }
  0xa0   : > { %564 = vmatmul.msk.f32.vlgmr.msrb.gmra.mxu0 %vm382_vm1, %v282_v19  ;;  %566 = vmatmul.msk.f32.vlgmr.msrb.gmra.mxu1 %vm382_vm1, %v311_v20 }
  0xa1   : > { %v339_v21 = vpop.f32.mrf.mxu2  ;;  %v368_v22 = vpop.f32.mrf.mxu3 }
  0xa2   : > { %v340_v23 = vadd.f32 %v339_v21, %v255_v16  ;;  %v369_v24 = vadd.f32 %v368_v22, %v255_v16 }
  0xa4   : > { %568 = vmatmul.msk.f32.vlgmr.msrb.gmra.mxu2 %vm382_vm1, %v340_v23  ;;  %570 = vmatmul.msk.f32.vlgmr.msrb.gmra.mxu3 %vm382_vm1, %v369_v24 }
  0xa5   : > { %v284_v26 = vpop.f32.mrf.mxu0  ;;  %v313_v27 = vpop.f32.mrf.mxu1 }
  0xa6   : > { %v285_v28 = vadd.f32 %v284_v26, %v256_v25  ;;  %v314_v29 = vadd.f32 %v313_v27, %v256_v25 }
  0xa8   : > { %565 = vmatmul.msk.f32.gmra.mxu0 %vm382_vm1, %v285_v28  ;;  %567 = vmatmul.msk.f32.gmra.mxu1 %vm382_vm1, %v314_v29 }
  0xa9   : > { %v342_v30 = vpop.f32.mrf.mxu2  ;;  %v371_v31 = vpop.f32.mrf.mxu3 }
  0xaa   : > { %v343_v32 = vadd.f32 %v342_v30, %v256_v25  ;;  %v372_v33 = vadd.f32 %v371_v31, %v256_v25 }
  0xac   : > { %569 = vmatmul.msk.f32.gmra.mxu2 %vm382_vm1, %v343_v32  ;;  %571 = vmatmul.msk.f32.gmra.mxu3 %vm382_vm1, %v372_v33 }
 0x11d   : > { %v424_v35 = vpop.f32.mrf.mxu0  ;;  %v430_v36 = vpop.f32.mrf.mxu1 }
 0x11e   : > { %v425_v37 = vadd.f32 %v646_v34, %v424_v35  ;;  %v431_v38 = vadd.f32 %v646_v34, %v430_v36 }
 0x120   : > { %448 = vst.msk [vmem:[%s235_s13] sm:$0xff] %vm382_vm1, %v425_v37 }
 0x121   : > { %450 = vst.msk [vmem:[%s235_s13 + $0x10] sm:$0xff] %vm382_vm1, %v431_v38 }
 0x125   : > { %v427_v39 = vpop.f32.mrf.mxu0  ;;  %v433_v40 = vpop.f32.mrf.mxu1 }
 0x126   : > { %v428_v41 = vadd.f32 %v646_v34, %v427_v39  ;;  %v434_v42 = vadd.f32 %v646_v34, %v433_v40 }
 0x127   : > { %v436_v43 = vpop.f32.mrf.mxu2  ;;  %v442_v44 = vpop.f32.mrf.mxu3 }
 0x128   : > { %v437_v45 = vadd.f32 %v646_v34, %v436_v43  ;;  %v443_v46 = vadd.f32 %v646_v34, %v442_v44  ;;  %449 = vst.msk [vmem:[%s235_s13 + $0x8] sm:$0xff] %vm382_vm1, %v428_v41 }
 0x129   : > { %451 = vst.msk [vmem:[%s235_s13 + $0x18] sm:$0xff] %vm382_vm1, %v434_v42 }
 0x12a   : > { %452 = vst.msk [vmem:[%s235_s13 + $0x20] sm:$0xff] %vm382_vm1, %v437_v45 }
 0x12b   : > { %454 = vst.msk [vmem:[%s235_s13 + $0x30] sm:$0xff] %vm382_vm1, %v443_v46 }
 0x12f   : > { %v439_v47 = vpop.f32.mrf.mxu2  ;;  %v445_v48 = vpop.f32.mrf.mxu3 }
 0x130   : > { %v440_v49 = vadd.f32 %v646_v34, %v439_v47  ;;  %v446_v50 = vadd.f32 %v646_v34, %v445_v48 }
 0x132   : > { %453 = vst.msk [vmem:[%s235_s13 + $0x28] sm:$0xff] %vm382_vm1, %v440_v49 }
 0x133   : > { %455 = vst.msk [vmem:[%s235_s13 + $0x38] sm:$0xff] %vm382_vm1, %v446_v50 }
 0x134   : > { %704 = shalt.err (!%p701_p8)
}
 0x135   : > { %s748_s9 = smov 128   ;;  %s749_s12 = smov 8  }
 0x136   : > { %596 = dma.vmem_to_hbm [thread:$0]  (%p818_p5), %s471_s23, 1024, %s473_s25, %s457_s22, %s748_s9, %s748_s9, %s749_s12  }
 0x137 PF: > { %p608_p9 = scmp.ge.s32.totalorder %s743_s21, 2  ;;  %s487_s13 = sand.u32 1, %s731_s18  }
 0x138   : > { %s488_s14 = scalar_lea.sflag [#allocation4], %s487_s13 }
 0x139   : > { %p603_p10 = pnand %p608_p9, %p822_p6 }
 0x13b   : > { %p604_p11 = pneg %p603_p10 }
 0x13d   : > { %726 = dma.done.wait (%p604_p11), %s488_s14, 1024  }
 0x13e   : > { %728 = vsyncadd (%p604_p11), %s488_s14, 4294966272  ;;  %p16_p12 = scmp.ge.s32.totalorder %s805_s24, 4   ;;  %s949_s18 = smov %s735_s19 }
 0x13f   : > { %s950_s19 = smov %s739_s20  ;;  %s951_s20 = smov %s816_s27 }
 0x140   : > { %s952_s21 = smov %s805_s24  ;;  %18 = sbr.rel (!%p16_p12) target bundleno = 4 (0x4), region = 80 }
 0x145   :  { %494 = vsyncpa [#allocation3], 1 }
 0x146   :  { %496 = vsyncpa [#allocation3 + $0x1], 1 }
 0x147   :  { %497 = vsyncpa [#allocation4], 1 }
 0x148   :  { %499 = vsyncpa [#allocation4 + $0x1], 1 }

</bundles_post_ra>
